<compile_context>
chip_gen: v5e
topology: v5e:2x2
jax: 0.10.0
libtpu: 0.0.40
codegen_flags: <defaults>
</compile_context>

<pallas_src>
import jax
import jax.numpy as jnp
from jax.experimental import pallas as pl
from jax.experimental.pallas import tpu as pltpu


# ----------------------------------------------------------------------------
# Pallas kernel: `nb` remask draws (both branches fused) per grid step
# ----------------------------------------------------------------------------
def _decoder_kernel(z_ref, adj_ref, x2_ref, w1_ref, w2_ref, b_ref, out_ref):
    # z_ref   (R, 2D)   bf16  R = nb*N rows: nb pre-remasked draws, [z_s | z_p]
    # adj_ref (R, R)    bf16  block-diagonal: adj repeated nb times (resident)
    # x2_ref  (R, 2F)   f32   [x_true | x_true] tiled nb times (resident)
    # w1_ref  (2D, 2H)  bf16  block_diag(gcn_W1, lin_W1)        (resident)
    # w2_ref  (2H, 2F)  bf16  block_diag(gcn_W2, lin_W2)        (resident)
    # b_ref   (2, W)    f32   row0 = [gcn_b1 | lin_b1], row1 = [gcn_b2 | lin_b2 | 0]
    # out_ref (nb, 128) f32   per-draw loss, broadcast lane-dense across 128 lanes
    r = z_ref.shape[0]
    hh = w1_ref.shape[1]          # 2 * hid_units
    ff = w2_ref.shape[1]          # 2 * ft_size
    nb = out_ref.shape[0]         # draws in this tile
    n = r // nb                   # nodes per draw
    f = ff // 2
    cdt = z_ref.dtype

    z = z_ref[...]
    adj = adj_ref[...]
    bias = b_ref[...]
    b1 = bias[0:1, :hh]           # (1, 2H)
    b2 = bias[1:2, :ff]           # (1, 2F)

    # ---- layer 1: one block-diagonal matmul for both branches, all draws ----
    h1 = jnp.dot(z, w1_ref[...], preferred_element_type=jnp.float32)          # (R, 2H)
    # GCN propagation for all nb draws at once via the block-diag adjacency.
    a1 = jnp.dot(adj, h1.astype(cdt), preferred_element_type=jnp.float32)     # (R, 2H)
    # GCN half (first H lanes) takes the adj-propagated value, Linear half the raw one.
    # (At 2H,2F <= 128 lanes the discarded half hides in lane padding; see TODO above.)
    col1 = jax.lax.broadcasted_iota(jnp.int32, (r, hh), 1) < (hh // 2)
    hid = jnp.maximum(jnp.where(col1, a1, h1) + b1, 0.0)                      # (R, 2H) f32

    # ---- layer 2 ----
    h2 = jnp.dot(hid.astype(cdt), w2_ref[...], preferred_element_type=jnp.float32)
    a2 = jnp.dot(adj, h2.astype(cdt), preferred_element_type=jnp.float32)
    col2 = jax.lax.broadcasted_iota(jnp.int32, (r, ff), 1) < f
    rec = jnp.where(col2, a2, h2) + b2                                        # (R, 2F)

    # ---- per-draw loss: mean(ds^2) + mean(dp^2) == sum([ds|dp]^2) / (N*F) ----
    d = rec - x2_ref[...]
    dsq = d * d
    inv = 1.0 / (n * f)
    for i in range(nb):                       # static unroll over draws in this tile
        di = dsq[i * n:(i + 1) * n, :]                       # (N, 2F) sublane-aligned
        lane_sum = jnp.sum(di, axis=1, keepdims=True)        # (N, 1)
        tot = jnp.sum(lane_sum, axis=0, keepdims=True)       # (1, 1)
        out_ref[i:i + 1, :] = jnp.broadcast_to(tot * inv, (1, out_ref.shape[1]))


# ----------------------------------------------------------------------------
# Host wrapper: layout-only packing (blend / concat / block-diag / casts)
# ----------------------------------------------------------------------------
def _block_diag(a, b):
    m, n = a.shape
    p, q = b.shape
    top = jnp.concatenate([a, jnp.zeros((m, q), a.dtype)], axis=1)
    bot = jnp.concatenate([jnp.zeros((p, n), b.dtype), b], axis=1)
    return jnp.concatenate([top, bot], axis=0)


def decoder_forward_pallas(s, p, mask_s, mask_p, token, adj, x_true, params,
                           draws_per_step=8, compute_dtype=jnp.bfloat16):
    """Fused Decoder forward over a batch of B remask-draw pairs.

    mask_s, mask_p: (B, N, 1) 0/1 row masks (1.0 = remasked row).
    Returns per-draw losses of shape (B,); element b equals the original
    Decoder.forward() output for that pair of random remasks.
    """
    (gw1, gb1, gw2, gb2, lw1, lb1, lw2, lb2) = params
    n, d = s.shape
    f = x_true.shape[1]
    h = gw1.shape[1]
    B = mask_s.shape[0]
    nb = min(draws_per_step, B)
    assert B % nb == 0, "batch of remask draws must be divisible by draws_per_step"
    T = B // nb
    R = nb * n
    hh, ff, wb = 2 * h, 2 * f, max(2 * h, 2 * f)
    LANES = 128

    # remask blend in f32 (1.0-mask rows keep rep, masked rows become the token),
    # single cast to the compute dtype right before the kernel.
    zs = s[None, :, :] * (1.0 - mask_s) + mask_s * token[None, :, :]     # (B, N, D)
    zp = p[None, :, :] * (1.0 - mask_p) + mask_p * token[None, :, :]     # (B, N, D)
    z = jnp.concatenate([zs, zp], axis=2).astype(compute_dtype).reshape(B * n, 2 * d)

    adj_blk = jnp.kron(jnp.eye(nb, dtype=adj.dtype), adj).astype(compute_dtype)  # (R, R)
    x2 = jnp.tile(jnp.concatenate([x_true, x_true], axis=1),
                  (nb, 1)).astype(jnp.float32)                                   # (R, 2F)
    w1 = _block_diag(gw1, lw1).astype(compute_dtype)                             # (2D, 2H)
    w2 = _block_diag(gw2, lw2).astype(compute_dtype)                             # (2H, 2F)

    b1 = jnp.concatenate([gb1, lb1], axis=1).astype(jnp.float32)                 # (1, 2H)
    b2 = jnp.concatenate([gb2, lb2], axis=1).astype(jnp.float32)                 # (1, 2F)
    baux = jnp.zeros((2, wb), jnp.float32)
    baux = baux.at[0, :hh].set(b1[0]).at[1, :ff].set(b2[0])                      # (2, W)

    grid_spec = pltpu.PrefetchScalarGridSpec(
        num_scalar_prefetch=0,
        grid=(T,),
        in_specs=[
            pl.BlockSpec((R, 2 * d), lambda t: (t, 0)),   # z: one tile of nb draws/step
            pl.BlockSpec((R, R), lambda t: (0, 0)),       # adj_blk: resident
            pl.BlockSpec((R, ff), lambda t: (0, 0)),      # x_true (tiled): resident
            pl.BlockSpec((2 * d, hh), lambda t: (0, 0)),  # W1: resident
            pl.BlockSpec((hh, ff), lambda t: (0, 0)),     # W2: resident
            pl.BlockSpec((2, wb), lambda t: (0, 0)),      # packed biases: resident
        ],
        out_specs=pl.BlockSpec((nb, LANES), lambda t: (t, 0)),
    )

    flops = T * 2 * R * ((2 * d) * hh + R * hh + hh * ff + R * ff)
    bytes_accessed = (z.size * 2 + adj_blk.size * 2 + x2.size * 4 +
                      w1.size * 2 + w2.size * 2 + baux.size * 4 + B * LANES * 4)

    out = pl.pallas_call(
        _decoder_kernel,
        out_shape=jax.ShapeDtypeStruct((B, LANES), jnp.float32),
        grid_spec=grid_spec,
        compiler_params=pltpu.CompilerParams(
            dimension_semantics=("parallel",),        # shards draws across TCs on v7x
            vmem_limit_bytes=32 * 1024 * 1024,        # explicit; safe on v5e/v6e/v7x
        ),
        cost_estimate=pl.CostEstimate(flops=int(flops), transcendentals=0,
                                      bytes_accessed=int(bytes_accessed)),
    )(z, adj_blk, x2, w1, w2, baux)
    return out[:, 0]


# ----------------------------------------------------------------------------
# Parameter / input construction (deterministic, synthetic)
# ----------------------------------------------------------------------------
def make_params(key, common_dim, hid_units, ft_size):
    ks = jax.random.split(key, 4)

    def init(k, shape):
        fan_in = shape[0]
        return (jax.random.normal(k, shape, jnp.float32) /
                jnp.sqrt(fan_in)).astype(jnp.float32)

    gw1 = init(ks[0], (common_dim, hid_units))
    gb1 = jnp.zeros((1, hid_units), jnp.float32)
    gw2 = init(ks[1], (hid_units, ft_size))
    gb2 = jnp.zeros((1, ft_size), jnp.float32)
    lw1 = init(ks[2], (common_dim, hid_units))
    lb1 = jnp.zeros((1, hid_units), jnp.float32)
    lw2 = init(ks[3], (hid_units, ft_size))
    lb2 = jnp.zeros((1, ft_size), jnp.float32)
    return (gw1, gb1, gw2, gb2, lw1, lb1, lw2, lb2)


def make_remask(key, num_nodes, remask_rate=0.5):
    """Random row-mask matching Decoder.random_remask (1.0 = remasked)."""
    perm = jax.random.permutation(key, num_nodes)
    num_remask = int(remask_rate * num_nodes)
    mask = jnp.zeros((num_nodes,), jnp.float32).at[perm[:num_remask]].set(1.0)
    return mask.reshape(num_nodes, 1)


if __name__ == "__main__":
    # args: common_dim=32, hid_units=32, ft_size=16, decolayer=2, dropout=0.1
    N, COMMON_DIM, HID, FT = 16, 32, 32, 16
    B = 16     # remask-draw batch amortizing launch + DMA over the grid
    NB = 8     # draws per grid step -> matmuls run with 128 MXU rows per step

    key = jax.random.PRNGKey(0)
    k_s, k_p, k_x, k_adj, k_par, k_tok, k_ms, k_mp = jax.random.split(key, 8)

    s = jax.random.normal(k_s, (N, COMMON_DIM), jnp.float32)       # structural rep
    p = jax.random.normal(k_p, (N, COMMON_DIM), jnp.float32)       # proximity rep
    x_true = jax.random.normal(k_x, (N, FT), jnp.float32)          # target features
    # symmetric row-normalized adjacency with self-loops
    a = (jax.random.uniform(k_adj, (N, N)) > 0.7).astype(jnp.float32)
    a = jnp.maximum(a, a.T) + jnp.eye(N, dtype=jnp.float32)
    adj = a / jnp.sum(a, axis=1, keepdims=True)

    params = make_params(k_par, COMMON_DIM, HID, FT)
    gw1, gb1, gw2, gb2, lw1, lb1, lw2, lb2 = params
    # non-zero mask token so the remask blend path is actually exercised
    token = 0.1 * jax.random.normal(k_tok, (1, COMMON_DIM), jnp.float32)

    mask_s = jnp.stack([make_remask(k, N) for k in jax.random.split(k_ms, B)])  # (B,N,1)
    mask_p = jnp.stack([make_remask(k, N) for k in jax.random.split(k_mp, B)])  # (B,N,1)

    losses = decoder_forward_pallas(s, p, mask_s, mask_p, token, adj, x_true,
                                    params, draws_per_step=NB)
    losses = jax.block_until_ready(losses)

    # ---- pure-JAX f32 reference (original module semantics), per draw ----
    def ref_pair_f32(ms, mp):
        z_s = s * (1 - ms) + ms * token
        z_p = p * (1 - mp) + mp * token
        hrf = jnp.maximum(adj @ (z_s @ gw1) + gb1, 0.0)
        rec_s = adj @ (hrf @ gw2) + gb2
        grf = jnp.maximum(z_p @ lw1 + lb1, 0.0)
        rec_p = grf @ lw2 + lb2
        return jnp.mean((rec_s - x_true) ** 2) + jnp.mean((rec_p - x_true) ** 2)

    # ---- bf16-operand reference matching the kernel's casts exactly ----
    def ref_pair_bf16(ms, mp):
        dt = jnp.bfloat16
        z_s = (s * (1 - ms) + ms * token).astype(dt)
        z_p = (p * (1 - mp) + mp * token).astype(dt)
        adj_c = adj.astype(dt)
        h1s = jnp.dot(z_s, gw1.astype(dt), preferred_element_type=jnp.float32)
        a1s = jnp.dot(adj_c, h1s.astype(dt), preferred_element_type=jnp.float32)
        hs = jnp.maximum(a1s + gb1, 0.0)
        h2s = jnp.dot(hs.astype(dt), gw2.astype(dt), preferred_element_type=jnp.float32)
        rec_s = jnp.dot(adj_c, h2s.astype(dt), preferred_element_type=jnp.float32) + gb2
        h1p = jnp.dot(z_p, lw1.astype(dt), preferred_element_type=jnp.float32)
        hp = jnp.maximum(h1p + lb1, 0.0)
        rec_p = jnp.dot(hp.astype(dt), lw2.astype(dt),
                        preferred_element_type=jnp.float32) + lb2
        return jnp.mean((rec_s - x_true) ** 2) + jnp.mean((rec_p - x_true) ** 2)

    ref16 = jax.vmap(ref_pair_bf16)(mask_s, mask_p)   # (B,)
    ref32 = jax.vmap(ref_pair_f32)(mask_s, mask_p)    # (B,)

    # Primary check: bf16-operand reference (tight).
    assert jnp.allclose(losses, ref16, rtol=1e-3, atol=1e-5), (losses, ref16)
    # Secondary check vs f32 reference: bf16 matmul operands -> expect O(1e-2)
    # relative deviation, hence the loose tolerance (documented, not hiding bugs).
    assert jnp.allclose(losses, ref32, rtol=5e-2, atol=5e-2), (losses, ref32)
    print("KERNEL_OK")
</pallas_src>

<mosaic_0001>
module attributes {stable_mosaic.version = 11 : i64} {
  func.func @_decoder_kernel(%arg0: i32, %arg1: memref<128x64xbf16, #tpu.memory_space<vmem>>, %arg2: memref<128x128xbf16, #tpu.memory_space<vmem>>, %arg3: memref<128x32xf32, #tpu.memory_space<vmem>>, %arg4: memref<64x64xbf16, #tpu.memory_space<vmem>>, %arg5: memref<64x32xbf16, #tpu.memory_space<vmem>>, %arg6: memref<2x64xf32, #tpu.memory_space<vmem>>, %arg7: memref<8x128xf32, #tpu.memory_space<vmem>>) attributes {dimension_semantics = [#tpu.dimension_semantics<parallel>], iteration_bounds = array<i64: 2>, scalar_prefetch = 0 : i64, scratch_operands = 0 : i64, tpu.core_type = #tpu.core_type<tc>, window_params = [{transform_indices = @transform_0, window_bounds = array<i64: 128, 64>}, {pipeline_mode = #tpu.pipeline_mode<synchronous>, transform_indices = @transform_1, window_bounds = array<i64: 128, 128>}, {pipeline_mode = #tpu.pipeline_mode<synchronous>, transform_indices = @transform_2, window_bounds = array<i64: 128, 32>}, {pipeline_mode = #tpu.pipeline_mode<synchronous>, transform_indices = @transform_3, window_bounds = array<i64: 64, 64>}, {pipeline_mode = #tpu.pipeline_mode<synchronous>, transform_indices = @transform_4, window_bounds = array<i64: 64, 32>}, {pipeline_mode = #tpu.pipeline_mode<synchronous>, transform_indices = @transform_5, window_bounds = array<i64: 2, 64>}, {transform_indices = @transform_6, window_bounds = array<i64: 8, 128>}]} {
    %c0 = arith.constant 0 : index
    %c0_0 = arith.constant 0 : index
    %0 = vector.load %arg1[%c0, %c0_0] : memref<128x64xbf16, #tpu.memory_space<vmem>>, vector<128x64xbf16>
    %c0_1 = arith.constant 0 : index
    %c0_2 = arith.constant 0 : index
    %1 = vector.load %arg2[%c0_1, %c0_2] : memref<128x128xbf16, #tpu.memory_space<vmem>>, vector<128x128xbf16>
    %c0_3 = arith.constant 0 : index
    %c0_4 = arith.constant 0 : index
    %2 = vector.load %arg6[%c0_3, %c0_4] : memref<2x64xf32, #tpu.memory_space<vmem>>, vector<2x64xf32>
    %3 = vector.extract_strided_slice %2 {offsets = [0, 0], sizes = [1, 64], strides = [1, 1]} : vector<2x64xf32> to vector<1x64xf32>
    %4 = vector.extract_strided_slice %2 {offsets = [1, 0], sizes = [1, 32], strides = [1, 1]} : vector<2x64xf32> to vector<1x32xf32>
    %c0_5 = arith.constant 0 : index
    %c0_6 = arith.constant 0 : index
    %5 = vector.load %arg4[%c0_5, %c0_6] : memref<64x64xbf16, #tpu.memory_space<vmem>>, vector<64x64xbf16>
    %cst = arith.constant dense<0.000000e+00> : vector<128x64xf32>
    %6 = tpu.matmul %0, %5, %cst {dimension_numbers = #tpu.dot_dimension_numbers<[1], [0], [0], [1], [0, 0, 1, 1], [], []>} : vector<128x64xbf16>, vector<64x64xbf16>, vector<128x64xf32> -> vector<128x64xf32>
    %7 = arith.truncf %6 : vector<128x64xf32> to vector<128x64xbf16>
    %cst_7 = arith.constant dense<0.000000e+00> : vector<128x64xf32>
    %8 = tpu.matmul %1, %7, %cst_7 {dimension_numbers = #tpu.dot_dimension_numbers<[1], [0], [0], [1], [0, 0, 1, 1], [], []>} : vector<128x128xbf16>, vector<128x64xbf16>, vector<128x64xf32> -> vector<128x64xf32>
    %9 = tpu.iota {dimensions = array<i32: 1>} : vector<128x64xi32>
    %c32_i32 = arith.constant 32 : i32
    %10 = vector.broadcast %c32_i32 : i32 to vector<128x64xi32>
    %11 = arith.cmpi slt, %9, %10 : vector<128x64xi32>
    %12 = arith.select %11, %8, %6 : vector<128x64xi1>, vector<128x64xf32>
    %13 = vector.broadcast %3 : vector<1x64xf32> to vector<128x64xf32>
    %14 = arith.addf %12, %13 : vector<128x64xf32>
    %cst_8 = arith.constant 0.000000e+00 : f32
    %15 = vector.broadcast %cst_8 : f32 to vector<128x64xf32>
    %16 = arith.maximumf %14, %15 : vector<128x64xf32>
    %17 = arith.truncf %16 : vector<128x64xf32> to vector<128x64xbf16>
    %c0_9 = arith.constant 0 : index
    %c0_10 = arith.constant 0 : index
    %18 = vector.load %arg5[%c0_9, %c0_10] : memref<64x32xbf16, #tpu.memory_space<vmem>>, vector<64x32xbf16>
    %cst_11 = arith.constant dense<0.000000e+00> : vector<128x32xf32>
    %19 = tpu.matmul %17, %18, %cst_11 {dimension_numbers = #tpu.dot_dimension_numbers<[1], [0], [0], [1], [0, 0, 1, 1], [], []>} : vector<128x64xbf16>, vector<64x32xbf16>, vector<128x32xf32> -> vector<128x32xf32>
    %20 = arith.truncf %19 : vector<128x32xf32> to vector<128x32xbf16>
    %cst_12 = arith.constant dense<0.000000e+00> : vector<128x32xf32>
    %21 = tpu.matmul %1, %20, %cst_12 {dimension_numbers = #tpu.dot_dimension_numbers<[1], [0], [0], [1], [0, 0, 1, 1], [], []>} : vector<128x128xbf16>, vector<128x32xbf16>, vector<128x32xf32> -> vector<128x32xf32>
    %22 = tpu.iota {dimensions = array<i32: 1>} : vector<128x32xi32>
    %c16_i32 = arith.constant 16 : i32
    %23 = vector.broadcast %c16_i32 : i32 to vector<128x32xi32>
    %24 = arith.cmpi slt, %22, %23 : vector<128x32xi32>
    %25 = arith.select %24, %21, %19 : vector<128x32xi1>, vector<128x32xf32>
    %26 = vector.broadcast %4 : vector<1x32xf32> to vector<128x32xf32>
    %27 = arith.addf %25, %26 : vector<128x32xf32>
    %c0_13 = arith.constant 0 : index
    %c0_14 = arith.constant 0 : index
    %28 = vector.load %arg3[%c0_13, %c0_14] : memref<128x32xf32, #tpu.memory_space<vmem>>, vector<128x32xf32>
    %29 = arith.subf %27, %28 : vector<128x32xf32>
    %30 = arith.mulf %29, %29 : vector<128x32xf32>
    %31 = vector.extract_strided_slice %30 {offsets = [0, 0], sizes = [16, 32], strides = [1, 1]} : vector<128x32xf32> to vector<16x32xf32>
    %cst_15 = arith.constant dense<0.000000e+00> : vector<16xf32>
    %32 = vector.multi_reduction <add>, %31, %cst_15 [1] : vector<16x32xf32> to vector<16xf32>
    %33 = vector.shape_cast %32 : vector<16xf32> to vector<16x1xf32>
    %cst_16 = arith.constant dense<0.000000e+00> : vector<1xf32>
    %34 = vector.multi_reduction <add>, %33, %cst_16 [0] : vector<16x1xf32> to vector<1xf32>
    %35 = vector.shape_cast %34 : vector<1xf32> to vector<1x1xf32>
    %cst_17 = arith.constant 3.906250e-03 : f32
    %36 = vector.broadcast %cst_17 : f32 to vector<1x1xf32>
    %37 = arith.mulf %35, %36 : vector<1x1xf32>
    %38 = vector.shape_cast %37 : vector<1x1xf32> to vector<1x1xf32>
    %39 = vector.broadcast %38 : vector<1x1xf32> to vector<1x128xf32>
    %c0_18 = arith.constant 0 : index
    %c0_19 = arith.constant 0 : index
    %40 = vector.load %arg7[%c0_18, %c0_19] : memref<8x128xf32, #tpu.memory_space<vmem>>, vector<1x128xf32>
    tpu.vector_store %arg7[%c0_18, %c0_19], %39 {strides = array<i32>} : memref<8x128xf32, #tpu.memory_space<vmem>>, vector<1x128xf32>,
    %41 = vector.extract_strided_slice %30 {offsets = [16, 0], sizes = [16, 32], strides = [1, 1]} : vector<128x32xf32> to vector<16x32xf32>
    %cst_20 = arith.constant dense<0.000000e+00> : vector<16xf32>
    %42 = vector.multi_reduction <add>, %41, %cst_20 [1] : vector<16x32xf32> to vector<16xf32>
    %43 = vector.shape_cast %42 : vector<16xf32> to vector<16x1xf32>
    %cst_21 = arith.constant dense<0.000000e+00> : vector<1xf32>
    %44 = vector.multi_reduction <add>, %43, %cst_21 [0] : vector<16x1xf32> to vector<1xf32>
    %45 = vector.shape_cast %44 : vector<1xf32> to vector<1x1xf32>
    %cst_22 = arith.constant 3.906250e-03 : f32
    %46 = vector.broadcast %cst_22 : f32 to vector<1x1xf32>
    %47 = arith.mulf %45, %46 : vector<1x1xf32>
    %48 = vector.shape_cast %47 : vector<1x1xf32> to vector<1x1xf32>
    %49 = vector.broadcast %48 : vector<1x1xf32> to vector<1x128xf32>
    %c1 = arith.constant 1 : index
    %c0_23 = arith.constant 0 : index
    %50 = vector.load %arg7[%c1, %c0_23] : memref<8x128xf32, #tpu.memory_space<vmem>>, vector<1x128xf32>
    tpu.vector_store %arg7[%c1, %c0_23], %49 {strides = array<i32>} : memref<8x128xf32, #tpu.memory_space<vmem>>, vector<1x128xf32>,
    %51 = vector.extract_strided_slice %30 {offsets = [32, 0], sizes = [16, 32], strides = [1, 1]} : vector<128x32xf32> to vector<16x32xf32>
    %cst_24 = arith.constant dense<0.000000e+00> : vector<16xf32>
    %52 = vector.multi_reduction <add>, %51, %cst_24 [1] : vector<16x32xf32> to vector<16xf32>
    %53 = vector.shape_cast %52 : vector<16xf32> to vector<16x1xf32>
    %cst_25 = arith.constant dense<0.000000e+00> : vector<1xf32>
    %54 = vector.multi_reduction <add>, %53, %cst_25 [0] : vector<16x1xf32> to vector<1xf32>
    %55 = vector.shape_cast %54 : vector<1xf32> to vector<1x1xf32>
    %cst_26 = arith.constant 3.906250e-03 : f32
    %56 = vector.broadcast %cst_26 : f32 to vector<1x1xf32>
    %57 = arith.mulf %55, %56 : vector<1x1xf32>
    %58 = vector.shape_cast %57 : vector<1x1xf32> to vector<1x1xf32>
    %59 = vector.broadcast %58 : vector<1x1xf32> to vector<1x128xf32>
    %c2 = arith.constant 2 : index
    %c0_27 = arith.constant 0 : index
    %60 = vector.load %arg7[%c2, %c0_27] : memref<8x128xf32, #tpu.memory_space<vmem>>, vector<1x128xf32>
    tpu.vector_store %arg7[%c2, %c0_27], %59 {strides = array<i32>} : memref<8x128xf32, #tpu.memory_space<vmem>>, vector<1x128xf32>,
    %61 = vector.extract_strided_slice %30 {offsets = [48, 0], sizes = [16, 32], strides = [1, 1]} : vector<128x32xf32> to vector<16x32xf32>
    %cst_28 = arith.constant dense<0.000000e+00> : vector<16xf32>
    %62 = vector.multi_reduction <add>, %61, %cst_28 [1] : vector<16x32xf32> to vector<16xf32>
    %63 = vector.shape_cast %62 : vector<16xf32> to vector<16x1xf32>
    %cst_29 = arith.constant dense<0.000000e+00> : vector<1xf32>
    %64 = vector.multi_reduction <add>, %63, %cst_29 [0] : vector<16x1xf32> to vector<1xf32>
    %65 = vector.shape_cast %64 : vector<1xf32> to vector<1x1xf32>
    %cst_30 = arith.constant 3.906250e-03 : f32
    %66 = vector.broadcast %cst_30 : f32 to vector<1x1xf32>
    %67 = arith.mulf %65, %66 : vector<1x1xf32>
    %68 = vector.shape_cast %67 : vector<1x1xf32> to vector<1x1xf32>
    %69 = vector.broadcast %68 : vector<1x1xf32> to vector<1x128xf32>
    %c3 = arith.constant 3 : index
    %c0_31 = arith.constant 0 : index
    %70 = vector.load %arg7[%c3, %c0_31] : memref<8x128xf32, #tpu.memory_space<vmem>>, vector<1x128xf32>
    tpu.vector_store %arg7[%c3, %c0_31], %69 {strides = array<i32>} : memref<8x128xf32, #tpu.memory_space<vmem>>, vector<1x128xf32>,
    %71 = vector.extract_strided_slice %30 {offsets = [64, 0], sizes = [16, 32], strides = [1, 1]} : vector<128x32xf32> to vector<16x32xf32>
    %cst_32 = arith.constant dense<0.000000e+00> : vector<16xf32>
    %72 = vector.multi_reduction <add>, %71, %cst_32 [1] : vector<16x32xf32> to vector<16xf32>
    %73 = vector.shape_cast %72 : vector<16xf32> to vector<16x1xf32>
    %cst_33 = arith.constant dense<0.000000e+00> : vector<1xf32>
    %74 = vector.multi_reduction <add>, %73, %cst_33 [0] : vector<16x1xf32> to vector<1xf32>
    %75 = vector.shape_cast %74 : vector<1xf32> to vector<1x1xf32>
    %cst_34 = arith.constant 3.906250e-03 : f32
    %76 = vector.broadcast %cst_34 : f32 to vector<1x1xf32>
    %77 = arith.mulf %75, %76 : vector<1x1xf32>
    %78 = vector.shape_cast %77 : vector<1x1xf32> to vector<1x1xf32>
    %79 = vector.broadcast %78 : vector<1x1xf32> to vector<1x128xf32>
    %c4 = arith.constant 4 : index
    %c0_35 = arith.constant 0 : index
    %80 = vector.load %arg7[%c4, %c0_35] : memref<8x128xf32, #tpu.memory_space<vmem>>, vector<1x128xf32>
    tpu.vector_store %arg7[%c4, %c0_35], %79 {strides = array<i32>} : memref<8x128xf32, #tpu.memory_space<vmem>>, vector<1x128xf32>,
    %81 = vector.extract_strided_slice %30 {offsets = [80, 0], sizes = [16, 32], strides = [1, 1]} : vector<128x32xf32> to vector<16x32xf32>
    %cst_36 = arith.constant dense<0.000000e+00> : vector<16xf32>
    %82 = vector.multi_reduction <add>, %81, %cst_36 [1] : vector<16x32xf32> to vector<16xf32>
    %83 = vector.shape_cast %82 : vector<16xf32> to vector<16x1xf32>
    %cst_37 = arith.constant dense<0.000000e+00> : vector<1xf32>
    %84 = vector.multi_reduction <add>, %83, %cst_37 [0] : vector<16x1xf32> to vector<1xf32>
    %85 = vector.shape_cast %84 : vector<1xf32> to vector<1x1xf32>
    %cst_38 = arith.constant 3.906250e-03 : f32
    %86 = vector.broadcast %cst_38 : f32 to vector<1x1xf32>
    %87 = arith.mulf %85, %86 : vector<1x1xf32>
    %88 = vector.shape_cast %87 : vector<1x1xf32> to vector<1x1xf32>
    %89 = vector.broadcast %88 : vector<1x1xf32> to vector<1x128xf32>
    %c5 = arith.constant 5 : index
    %c0_39 = arith.constant 0 : index
    %90 = vector.load %arg7[%c5, %c0_39] : memref<8x128xf32, #tpu.memory_space<vmem>>, vector<1x128xf32>
    tpu.vector_store %arg7[%c5, %c0_39], %89 {strides = array<i32>} : memref<8x128xf32, #tpu.memory_space<vmem>>, vector<1x128xf32>,
    %91 = vector.extract_strided_slice %30 {offsets = [96, 0], sizes = [16, 32], strides = [1, 1]} : vector<128x32xf32> to vector<16x32xf32>
    %cst_40 = arith.constant dense<0.000000e+00> : vector<16xf32>
    %92 = vector.multi_reduction <add>, %91, %cst_40 [1] : vector<16x32xf32> to vector<16xf32>
    %93 = vector.shape_cast %92 : vector<16xf32> to vector<16x1xf32>
    %cst_41 = arith.constant dense<0.000000e+00> : vector<1xf32>
    %94 = vector.multi_reduction <add>, %93, %cst_41 [0] : vector<16x1xf32> to vector<1xf32>
    %95 = vector.shape_cast %94 : vector<1xf32> to vector<1x1xf32>
    %cst_42 = arith.constant 3.906250e-03 : f32
    %96 = vector.broadcast %cst_42 : f32 to vector<1x1xf32>
    %97 = arith.mulf %95, %96 : vector<1x1xf32>
    %98 = vector.shape_cast %97 : vector<1x1xf32> to vector<1x1xf32>
    %99 = vector.broadcast %98 : vector<1x1xf32> to vector<1x128xf32>
    %c6 = arith.constant 6 : index
    %c0_43 = arith.constant 0 : index
    %100 = vector.load %arg7[%c6, %c0_43] : memref<8x128xf32, #tpu.memory_space<vmem>>, vector<1x128xf32>
    tpu.vector_store %arg7[%c6, %c0_43], %99 {strides = array<i32>} : memref<8x128xf32, #tpu.memory_space<vmem>>, vector<1x128xf32>,
    %101 = vector.extract_strided_slice %30 {offsets = [112, 0], sizes = [16, 32], strides = [1, 1]} : vector<128x32xf32> to vector<16x32xf32>
    %cst_44 = arith.constant dense<0.000000e+00> : vector<16xf32>
    %102 = vector.multi_reduction <add>, %101, %cst_44 [1] : vector<16x32xf32> to vector<16xf32>
    %103 = vector.shape_cast %102 : vector<16xf32> to vector<16x1xf32>
    %cst_45 = arith.constant dense<0.000000e+00> : vector<1xf32>
    %104 = vector.multi_reduction <add>, %103, %cst_45 [0] : vector<16x1xf32> to vector<1xf32>
    %105 = vector.shape_cast %104 : vector<1xf32> to vector<1x1xf32>
    %cst_46 = arith.constant 3.906250e-03 : f32
    %106 = vector.broadcast %cst_46 : f32 to vector<1x1xf32>
    %107 = arith.mulf %105, %106 : vector<1x1xf32>
    %108 = vector.shape_cast %107 : vector<1x1xf32> to vector<1x1xf32>
    %109 = vector.broadcast %108 : vector<1x1xf32> to vector<1x128xf32>
    %c7 = arith.constant 7 : index
    %c0_47 = arith.constant 0 : index
    %110 = vector.load %arg7[%c7, %c0_47] : memref<8x128xf32, #tpu.memory_space<vmem>>, vector<1x128xf32>
    tpu.vector_store %arg7[%c7, %c0_47], %109 {strides = array<i32>} : memref<8x128xf32, #tpu.memory_space<vmem>>, vector<1x128xf32>,
    return
  }
  func.func @transform_0(%arg0: i32) -> (i32, i32) {
    %c0_i32 = arith.constant 0 : i32
    %c0_i32_0 = arith.constant 0 : i32
    return %arg0, %c0_i32 : i32, i32
  }
  func.func @transform_1(%arg0: i32) -> (i32, i32) {
    %c0_i32 = arith.constant 0 : i32
    %c0_i32_0 = arith.constant 0 : i32
    %c0_i32_1 = arith.constant 0 : i32
    return %c0_i32, %c0_i32_0 : i32, i32
  }
  func.func @transform_2(%arg0: i32) -> (i32, i32) {
    %c0_i32 = arith.constant 0 : i32
    %c0_i32_0 = arith.constant 0 : i32
    %c0_i32_1 = arith.constant 0 : i32
    return %c0_i32, %c0_i32_0 : i32, i32
  }
  func.func @transform_3(%arg0: i32) -> (i32, i32) {
    %c0_i32 = arith.constant 0 : i32
    %c0_i32_0 = arith.constant 0 : i32
    %c0_i32_1 = arith.constant 0 : i32
    return %c0_i32, %c0_i32_0 : i32, i32
  }
  func.func @transform_4(%arg0: i32) -> (i32, i32) {
    %c0_i32 = arith.constant 0 : i32
    %c0_i32_0 = arith.constant 0 : i32
    %c0_i32_1 = arith.constant 0 : i32
    return %c0_i32, %c0_i32_0 : i32, i32
  }
  func.func @transform_5(%arg0: i32) -> (i32, i32) {
    %c0_i32 = arith.constant 0 : i32
    %c0_i32_0 = arith.constant 0 : i32
    %c0_i32_1 = arith.constant 0 : i32
    return %c0_i32, %c0_i32_0 : i32, i32
  }
  func.func @transform_6(%arg0: i32) -> (i32, i32) {
    %c0_i32 = arith.constant 0 : i32
    %c0_i32_0 = arith.constant 0 : i32
    return %arg0, %c0_i32 : i32, i32
  }
}

</mosaic_0001>

<bundles_post_ra>
// kernel: tpu_custom_call.1
= control target key start
LH: loop header
LB: loop body
LE: loop exit
PB: predicated region body
PF: predicated region fallthrough
CT: control target
= control target key end

     0   :  { %11 = vsyncpa [#allocation3], 0  ;;  %s1808_s0 = inlined_call_operand.vmem [shape: bf16[256,64], index: 0, kind: input, shape index: {}]   ;;  %s1809_s1 = inlined_call_operand.vmem [shape: bf16[128,128], index: 1, kind: input, shape index: {}]   ;;  %s1810_s2 = inlined_call_operand.vmem [shape: f32[128,32], index: 2, kind: input, shape index: {}]   ;;  %s1811_s3 = inlined_call_operand.vmem [shape: bf16[64,64], index: 3, kind: input, shape index: {}]   ;;  %s1812_s4 = inlined_call_operand.vmem [shape: bf16[64,32], index: 4, kind: input, shape index: {}]   ;;  %s1813_s5 = inlined_call_operand.vmem [shape: f32[2,64], index: 5, kind: input, shape index: {}]   ;;  %s1814_s6 = inlined_call_operand.hbm [shape: f32[16,128], index: 6, kind: output, shape index: {}]  }
   0x1   :  { %13 = vsyncpa [#allocation3 + $0x1], 0  ;;  %s1322_s21 = smov 0   ;;  %s1324_s22 = smov 0  }
   0x2   :  { %s1326_s23 = smov 0   ;;  %s1328_s24 = smov 0  }
   0x3 LB: > { %s1343_s25 = sadd.s32 4294967295, %s1285_s24   ;;  %s1037_s26 = sadd.s32 4294967294, %s1285_s24   ;;  %s1285_s24 = sphi %s1328_s24, %s1820_s24   ;;  %s1281_s23 = sphi %s1326_s23, %s1819_s23   ;;  %s1277_s22 = sphi %s1324_s22, %s1818_s22   ;;  %s1273_s21 = sphi %s1322_s21, %s1817_s21  }
   0x4   : > { %s1347_s27 = sadd.s32 1, %s1285_s24   ;;  %s157_s28 = sadd.s32 1, %s1281_s23 }
   0x5   : > { %s154_s29 = ssub.s32 %s1285_s24, %s1347_s27  ;;  %p167_p0 = scmp.ne.s32.totalorder %s1281_s23, %s1277_s22 }
   0x6   : > { %p155_p1 = scmp.eq.s32.totalorder %s154_s29, 0  ;;  %p168_p2 = scmp.eq.s32.totalorder %s1343_s25, 1 }
   0x7   : > { %p173_p3 = scmp.ne.s32.totalorder %s1277_s22, %s1273_s21  ;;  %p174_p4 = scmp.eq.s32.totalorder %s1037_s26, 1 }
   0x8   : > { %s1358_s30 = scalar_select %p155_p1, %s1281_s23, %s157_s28  }
   0x9   : > { %p1360_p5 = por %p168_p2, %p167_p0  ;;  %p1364_p6 = por %p174_p4, %p173_p3 }
   0xa   : > { %p1040_p7 = scmp.ge.s32.totalorder %s1285_s24, 1  ;;  %p216_p8 = scmp.lt.s32.totalorder %s1285_s24, 3 }
   0xc   : > { %p217_p9 = pnand %p1040_p7, %p216_p8 }
   0xd   : > { %s1042_s11 = sshll.u32 (!%p217_p9), %s1343_s25, 4  ;;  %s243_s20 = sand.u32 (!%p217_p9), 1, %s1277_s22  }
   0xe   : > { %220 = sbr.rel (%p217_p9) target bundleno = 1135 (0x46f), region = 44  ;;  %p247_p10 = scmp.lt.s32.totalorder (!%p217_p9), %s1042_s11, 31 }
   0xf   : > { %s1157_s29 = sshll.u32 (!%p217_p9), %s1343_s25, 3  ;;  %s963_s14 = scalar_lea.sflag (!%p217_p9), [#allocation3], %s243_s20 }
  0x10   : > { %s1243_s18 = scalar_lea.hbm (!%p217_p9), %s1814_s6, 16 }
  0x13   : > { %v1179_v0 = vld [vmem:[%s1811_s3 + $0x18] sm:$0xff]  ;;  %v1178_v1 = vld [vmem:[%s1811_s3 + $0x10] sm:$0xff]  ;;  %s1822_s11 = smov (!%p247_p10, %s1042_s11), 31  ;;  %v1177_v2 = vld [vmem:[%s1811_s3 + $0x8] sm:$0xff]  ;;  %vm358_vm0 = vcmask 523264   ;;  %v537_v48 = vlaneseq  ;;  %vm841_vm3 = vcmask 261120  }
  0x14   : > { %387 = vmatpush.bf16.msra.mxu0 %v1179_v0  ;;  %s1043_s16 = sshll.u32 %s1822_s11, 2  ;;  %v1176_v3 = vld [vmem:[%s1811_s3] sm:$0xff]  ;;  %v1451_v37 = vld [vmem:[%s1809_s1 + $0x8] sm:$0xff]  ;;  %v1457_v38 = vld [vmem:[%s1809_s1 + $0x10] sm:$0xff]  ;;  %s973_s11 = scalar_lea.hbm %s1814_s6, %s1157_s29 }
  0x15   : > { %s250_s26 = scalar_lea.vmem %s1808_s0, %s1043_s16  ;;  %v1445_v36 = vld [vmem:[%s1809_s1] sm:$0xff]  ;;  %v1463_v39 = vld [vmem:[%s1809_s1 + $0x18] sm:$0xff]  ;;  %v1475_v41 = vld [vmem:[%s1809_s1 + $0x28] sm:$0xff]  ;;  %v1502_v49 = vand.u32 127, %v537_v48  ;;  %s977_s13 = sshll.u32 %s973_s11, 4  ;;  %s978_s13 = int_to_ptr.hbm [resolvable:$true] %s977_s13 }
  0x16   : > { %v1160_v4 = vld [vmem:[%s250_s26] sm:$0xff]  ;;  %v1161_v5 = vld [vmem:[%s250_s26 + $0x8] sm:$0xff]  ;;  %v1162_v6 = vld [vmem:[%s250_s26 + $0x10] sm:$0xff]  ;;  %s1237_s15 = sshra.s32 %s978_s13, 4  ;;  %s1238_s15 = int_to_ptr.hbm [resolvable:$true] %s1237_s15 }
  0x17   : > { %v1163_v7 = vld [vmem:[%s250_s26 + $0x18] sm:$0xff]  ;;  %v1164_v8 = vld [vmem:[%s250_s26 + $0x20] sm:$0xff]  ;;  %v1165_v9 = vld [vmem:[%s250_s26 + $0x28] sm:$0xff]  ;;  %vm539_vm1 = vcmp.lt.s32.totalorder %v1502_v49, 32  ;;  %vm759_vm2 = vcmp.lt.s32.totalorder %v1502_v49, 16  ;;  %s1239_s25 = scalar_lea.hbm %s1238_s15, 8  ;;  %p1244_p0 = scmp.lt.s32.totalorder %s1238_s15, %s1814_s6 }
  0x18   : > { %388 = vmatpush.bf16.msra.mxu0 %v1178_v1  ;;  %v1166_v10 = vld [vmem:[%s250_s26 + $0x30] sm:$0xff]  ;;  %v1167_v11 = vld [vmem:[%s250_s26 + $0x38] sm:$0xff]  ;;  %v1469_v40 = vld [vmem:[%s1809_s1 + $0x20] sm:$0xff]  ;;  %s1041_s26 = sshll.u32 %s243_s20, 3  ;;  %p1240_p11 = scmp.ne.s32.totalorder %s1238_s15, %s1239_s25 }
  0x19   : > { %v1481_v42 = vld [vmem:[%s1809_s1 + $0x30] sm:$0xff]  ;;  %v1183_v43 = vld [vmem:[%s1812_s4 + $0x18] sm:$0xff]  ;;  %v1181_v45 = vld [vmem:[%s1812_s4 + $0x8] sm:$0xff]  ;;  %s1764_s28 = scalar_lea.vmem [#allocation2], %s1041_s26  ;;  %p1245_p1 = scmp.lt.s32.totalorder %s1243_s18, %s1239_s25 }
  0x1a   : > { %657 = vmatpush.bf16.msra.mxu2 %v1183_v43  ;;  %v1182_v44 = vld [vmem:[%s1812_s4 + $0x10] sm:$0xff]  ;;  %v1180_v46 = vld [vmem:[%s1812_s4] sm:$0xff]  ;;  %v1499_v47 = vld [vmem:[%s1809_s1 + $0x38] sm:$0xff]  ;;  %s975_s12 = sshll.u32 %s1764_s28, 4  ;;  %p1241_p12 = pnand %p1240_p11, %p1360_p5  ;;  %s976_s12 = int_to_ptr.vmem [resolvable:$true] %s975_s12 }
  0x1b   : > { %v1507_v51 = vld [vmem:[%s1813_s5] sm:$0x3]  ;;  %p1246_p2 = por %p1245_p1, %p1244_p0 }
  0x1c   : > { %389 = vmatpush.bf16.msra.mxu0 %v1177_v2  ;;  %v1511_v52 = vperm.slane %v1507_v51, 0  ;;  %p1242_p13 = pneg %p1241_p12 }
  0x1e   : > { %658 = vmatpush.bf16.msra.mxu2 %v1182_v44  ;;  %p1247_p3 = pnand %p1246_p2, %p1242_p13 }
  0x20   : > { %390 = vmatpush.bf16.msra.mxu0 %v1176_v3 }
  0x22   : > { %659 = vmatpush.bf16.msra.mxu2 %v1181_v45 }
  0x23   : > { %1092 = vmatmul.msk.bf16.vlgmr.msra.gmra.mxu0 %vm358_vm0, %v1160_v4 }
  0x26   : > { %660 = vmatpush.bf16.msra.mxu2 %v1180_v46 }
  0x33   : > { %1093 = vmatmul.msk.bf16.gmra.mxu0 %vm358_vm0, %v1161_v5 }
  0x43   : > { %1094 = vmatmul.msk.bf16.gmra.mxu0 %vm358_vm0, %v1162_v6 }
  0x53   : > { %1095 = vmatmul.msk.bf16.gmra.mxu0 %vm358_vm0, %v1163_v7 }
  0x63   : > { %1096 = vmatmul.msk.bf16.gmra.mxu0 %vm358_vm0, %v1164_v8 }
  0x73   : > { %1097 = vmatmul.msk.bf16.gmra.mxu0 %vm358_vm0, %v1165_v9 }
  0x83   : > { %1098 = vmatmul.msk.bf16.gmra.mxu0 %vm358_vm0, %v1166_v10 }
  0x93   : > { %1099 = vmatmul.msk.bf16.gmra.mxu0 %vm358_vm0, %v1167_v11 }
  0xa0   : > { %v1394_v12 = vpop.f32.mrf.mxu0 }
  0xa8   : > { %v1396_v13 = vpop.f32.mrf.mxu0 }
  0xa9   : > { %v432_v35 = vpack.c.bf16 %v1396_v13, %v1394_v12 }
  0xb0   : > { %v1398_v14 = vpop.f32.mrf.mxu0 }
  0xb8   : > { %v1400_v15 = vpop.f32.mrf.mxu0 }
  0xb9   : > { %v433_v34 = vpack.c.bf16 %v1400_v15, %v1398_v14 }
  0xc0   : > { %v1402_v16 = vpop.f32.mrf.mxu0 }
  0xc8   : > { %v1404_v17 = vpop.f32.mrf.mxu0 }
  0xc9   : > { %v434_v33 = vpack.c.bf16 %v1404_v17, %v1402_v16 }
  0xd0   : > { %v1406_v18 = vpop.f32.mrf.mxu0 }
  0xd8   : > { %v1408_v19 = vpop.f32.mrf.mxu0 }
  0xd9   : > { %v435_v32 = vpack.c.bf16 %v1408_v19, %v1406_v18 }
  0xe0   : > { %v1410_v20 = vpop.f32.mrf.mxu0 }
  0xe8   : > { %v1412_v21 = vpop.f32.mrf.mxu0 }
  0xe9   : > { %v436_v31 = vpack.c.bf16 %v1412_v21, %v1410_v20 }
  0xf0   : > { %v1414_v22 = vpop.f32.mrf.mxu0 }
  0xf8   : > { %v1416_v23 = vpop.f32.mrf.mxu0 }
  0xf9   : > { %v437_v30 = vpack.c.bf16 %v1416_v23, %v1414_v22 }
 0x100   : > { %v1418_v24 = vpop.f32.mrf.mxu0 }
 0x108   : > { %v1420_v25 = vpop.f32.mrf.mxu0 }
 0x109   : > { %v438_v29 = vpack.c.bf16 %v1420_v25, %v1418_v24 }
 0x110   : > { %v1422_v26 = vpop.f32.mrf.mxu0 }
 0x118   : > { %v1424_v27 = vpop.f32.mrf.mxu0 }
 0x119   : > { %v439_v28 = vpack.c.bf16 %v1424_v27, %v1422_v26 }
 0x11b   : > { %488 = vmatpush.bf16.msra.mxu1 %v439_v28 }
 0x11f   : > { %489 = vmatpush.bf16.msra.mxu1 %v438_v29 }
 0x123   : > { %490 = vmatpush.bf16.msra.mxu1 %v437_v30 }
 0x127   : > { %491 = vmatpush.bf16.msra.mxu1 %v436_v31 }
 0x12b   : > { %492 = vmatpush.bf16.msra.mxu1 %v435_v32 }
 0x12f   : > { %493 = vmatpush.bf16.msra.mxu1 %v434_v33 }
 0x133   : > { %494 = vmatpush.bf16.msra.mxu1 %v433_v34 }
 0x137   : > { %495 = vmatpush.bf16.msra.mxu1 %v432_v35 }
 0x13a   : > { %496 = vmatmul.bf16.vlgmr.msra.gmra.mxu1 %v1445_v36 }
 0x14a   : > { %501 = vmatmul.bf16.gmra.mxu1 %v1451_v37 }
 0x15a   : > { %506 = vmatmul.bf16.gmra.mxu1 %v1457_v38 }
 0x16a   : > { %511 = vmatmul.bf16.gmra.mxu1 %v1463_v39 }
 0x17a   : > { %516 = vmatmul.bf16.gmra.mxu1 %v1469_v40 }
 0x18a   : > { %521 = vmatmul.bf16.gmra.mxu1 %v1475_v41 }
 0x19a   : > { %526 = vmatmul.bf16.gmra.mxu1 %v1481_v42 }
 0x1aa   : > { %531 = vmatmul.bf16.gmra.mxu1 %v1499_v47 }
 0x1b7   : > { %v497_v50 = vpop.f32.mrf.mxu1 }
 0x1b8   : > { %v540_v53 = vsel %vm539_vm1, %v497_v50, %v1394_v12 }
 0x1b9   : > { %v557_v54 = vadd.f32 %v1511_v52, %v540_v53 }
 0x1bb   : > { %v573_v58 = vmax.f32 %v557_v54, 0.0 }
 0x1bf   : > { %v499_v55 = vpop.f32.mrf.mxu1 }
 0x1c0   : > { %v541_v56 = vsel %vm539_vm1, %v499_v55, %v1396_v13 }
 0x1c1   : > { %v558_v57 = vadd.f32 %v1511_v52, %v541_v56 }
 0x1c3   : > { %v574_v59 = vmax.f32 %v558_v57, 0.0 }
 0x1c5   : > { %v589_v60 = vpack.c.bf16 %v574_v59, %v573_v58 }
 0x1c7   : > { %v502_v61 = vpop.f32.mrf.mxu1  ;;  %1148 = vmatmul.msk.bf16.vlgmr.msra.gmra.mxu2 %vm358_vm0, %v589_v60 }
 0x1c8   : > { %v542_v62 = vsel %vm539_vm1, %v502_v61, %v1398_v14 }
 0x1c9   : > { %v559_v63 = vadd.f32 %v1511_v52, %v542_v62 }
 0x1cb   : > { %v575_v3 = vmax.f32 %v559_v63, 0.0 }
 0x1cf   : > { %v504_v0 = vpop.f32.mrf.mxu1 }
 0x1d0   : > { %v543_v1 = vsel %vm539_vm1, %v504_v0, %v1400_v15 }
 0x1d1   : > { %v560_v2 = vadd.f32 %v1511_v52, %v543_v1 }
 0x1d3   : > { %v576_v4 = vmax.f32 %v560_v2, 0.0 }
 0x1d5   : > { %v590_v5 = vpack.c.bf16 %v576_v4, %v575_v3 }
 0x1d7   : > { %v507_v6 = vpop.f32.mrf.mxu1  ;;  %1149 = vmatmul.msk.bf16.gmra.mxu2 %vm358_vm0, %v590_v5 }
 0x1d8   : > { %v544_v7 = vsel %vm539_vm1, %v507_v6, %v1402_v16 }
 0x1d9   : > { %v561_v8 = vadd.f32 %v1511_v52, %v544_v7 }
 0x1db   : > { %v577_v12 = vmax.f32 %v561_v8, 0.0 }
 0x1df   : > { %v509_v9 = vpop.f32.mrf.mxu1 }
 0x1e0   : > { %v545_v10 = vsel %vm539_vm1, %v509_v9, %v1404_v17 }
 0x1e1   : > { %v562_v11 = vadd.f32 %v1511_v52, %v545_v10 }
 0x1e3   : > { %v578_v13 = vmax.f32 %v562_v11, 0.0 }
 0x1e5   : > { %v591_v14 = vpack.c.bf16 %v578_v13, %v577_v12 }
 0x1e7   : > { %v512_v15 = vpop.f32.mrf.mxu1  ;;  %1150 = vmatmul.msk.bf16.gmra.mxu2 %vm358_vm0, %v591_v14 }
 0x1e8   : > { %v546_v28 = vsel %vm539_vm1, %v512_v15, %v1406_v18 }
 0x1e9   : > { %v563_v16 = vadd.f32 %v1511_v52, %v546_v28 }
 0x1eb   : > { %v579_v31 = vmax.f32 %v563_v16, 0.0 }
 0x1ef   : > { %v514_v29 = vpop.f32.mrf.mxu1 }
 0x1f0   : > { %v547_v30 = vsel %vm539_vm1, %v514_v29, %v1408_v19 }
 0x1f1   : > { %v564_v17 = vadd.f32 %v1511_v52, %v547_v30 }
 0x1f3   : > { %v580_v32 = vmax.f32 %v564_v17, 0.0 }
 0x1f5   : > { %v592_v33 = vpack.c.bf16 %v580_v32, %v579_v31 }
 0x1f7   : > { %v517_v34 = vpop.f32.mrf.mxu1  ;;  %1151 = vmatmul.msk.bf16.gmra.mxu2 %vm358_vm0, %v592_v33 }
 0x1f8   : > { %v548_v35 = vsel %vm539_vm1, %v517_v34, %v1410_v20 }
 0x1f9   : > { %v565_v18 = vadd.f32 %v1511_v52, %v548_v35 }
 0x1fb   : > { %v581_v45 = vmax.f32 %v565_v18, 0.0 }
 0x1ff   : > { %v519_v43 = vpop.f32.mrf.mxu1 }
 0x200   : > { %v549_v44 = vsel %vm539_vm1, %v519_v43, %v1412_v21 }
 0x201   : > { %v566_v19 = vadd.f32 %v1511_v52, %v549_v44 }
 0x203   : > { %v582_v46 = vmax.f32 %v566_v19, 0.0 }
 0x205   : > { %v593_v48 = vpack.c.bf16 %v582_v46, %v581_v45  ;;  %v1634_v45 = vperm.slane %v1507_v51, 1  ;;  %v794_v46 = vld [vmem:[%s1810_s2 + $0x8] sm:$0xff] }
 0x207   : > { %v522_v50 = vpop.f32.mrf.mxu1  ;;  %1152 = vmatmul.msk.bf16.gmra.mxu2 %vm358_vm0, %v593_v48 }
 0x208   : > { %v550_v53 = vsel %vm539_vm1, %v522_v50, %v1414_v22 }
 0x209   : > { %v567_v20 = vadd.f32 %v1511_v52, %v550_v53 }
 0x20b   : > { %v583_v56 = vmax.f32 %v567_v20, 0.0 }
 0x20f   : > { %v524_v54 = vpop.f32.mrf.mxu1 }
 0x210   : > { %v551_v55 = vsel %vm539_vm1, %v524_v54, %v1416_v23 }
 0x211   : > { %v568_v21 = vadd.f32 %v1511_v52, %v551_v55 }
 0x213   : > { %v584_v57 = vmax.f32 %v568_v21, 0.0  ;;  %v795_v21 = vld [vmem:[%s1810_s2 + $0x10] sm:$0xff] }
 0x215   : > { %v594_v58 = vpack.c.bf16 %v584_v57, %v583_v56 }
 0x217   : > { %v527_v59 = vpop.f32.mrf.mxu1  ;;  %1153 = vmatmul.msk.bf16.gmra.mxu2 %vm358_vm0, %v594_v58 }
 0x218   : > { %v552_v60 = vsel %vm539_vm1, %v527_v59, %v1418_v24 }
 0x219   : > { %v569_v22 = vadd.f32 %v1511_v52, %v552_v60 }
 0x21b   : > { %v585_v63 = vmax.f32 %v569_v22, 0.0 }
 0x21f   : > { %v529_v61 = vpop.f32.mrf.mxu1 }
 0x220   : > { %v553_v62 = vsel %vm539_vm1, %v529_v61, %v1420_v25  ;;  %v796_v61 = vld [vmem:[%s1810_s2 + $0x18] sm:$0xff] }
 0x221   : > { %v570_v23 = vadd.f32 %v1511_v52, %v553_v62 }
 0x223   : > { %v586_v0 = vmax.f32 %v570_v23, 0.0 }
 0x225   : > { %v595_v1 = vpack.c.bf16 %v586_v0, %v585_v63 }
 0x227   : > { %v532_v2 = vpop.f32.mrf.mxu1  ;;  %1154 = vmatmul.msk.bf16.gmra.mxu2 %vm358_vm0, %v595_v1 }
 0x228   : > { %v554_v3 = vsel %vm539_vm1, %v532_v2, %v1422_v26 }
 0x229   : > { %v571_v24 = vadd.f32 %v1511_v52, %v554_v3  ;;  %v797_v3 = vld [vmem:[%s1810_s2 + $0x20] sm:$0xff] }
 0x22b   : > { %v587_v6 = vmax.f32 %v571_v24, 0.0 }
 0x22f   : > { %v534_v4 = vpop.f32.mrf.mxu1 }
 0x230   : > { %v555_v5 = vsel %vm539_vm1, %v534_v4, %v1424_v27 }
 0x231   : > { %v572_v25 = vadd.f32 %v1511_v52, %v555_v5 }
 0x233   : > { %v588_v7 = vmax.f32 %v572_v25, 0.0 }
 0x235   : > { %v596_v8 = vpack.c.bf16 %v588_v7, %v587_v6 }
 0x237   : > { %1155 = vmatmul.msk.bf16.gmra.mxu2 %vm358_vm0, %v596_v8  ;;  %v798_v8 = vld [vmem:[%s1810_s2 + $0x28] sm:$0xff] }
 0x24a   : > { %v662_v9 = vpop.f32.mrf.mxu2 }
 0x252   : > { %v664_v10 = vpop.f32.mrf.mxu2 }
 0x253   : > { %v702_v19 = vpack.c.bf16 %v664_v10, %v662_v9 }
 0x25a   : > { %v667_v11 = vpop.f32.mrf.mxu2 }
 0x262   : > { %v1585_v12 = vpop.f32.mrf.mxu2 }
 0x263   : > { %v703_v44 = vpack.c.bf16 %v1585_v12, %v667_v11 }
 0x26a   : > { %v1587_v26 = vpop.f32.mrf.mxu2 }
 0x272   : > { %v1589_v13 = vpop.f32.mrf.mxu2 }
 0x273   : > { %v704_v43 = vpack.c.bf16 %v1589_v13, %v1587_v26 }
 0x27a   : > { %v1591_v14 = vpop.f32.mrf.mxu2 }
 0x282   : > { %v1593_v15 = vpop.f32.mrf.mxu2 }
 0x283   : > { %v705_v18 = vpack.c.bf16 %v1593_v15, %v1591_v14 }
 0x28a   : > { %v1595_v27 = vpop.f32.mrf.mxu2 }
 0x292   : > { %v1597_v52 = vpop.f32.mrf.mxu2 }
 0x293   : > { %v706_v35 = vpack.c.bf16 %v1597_v52, %v1595_v27 }
 0x29a   : > { %v1599_v28 = vpop.f32.mrf.mxu2 }
 0x2a2   : > { %v1601_v16 = vpop.f32.mrf.mxu2 }
 0x2a3   : > { %v707_v34 = vpack.c.bf16 %v1601_v16, %v1599_v28 }
 0x2aa   : > { %v1603_v29 = vpop.f32.mrf.mxu2 }
 0x2b2   : > { %v1605_v30 = vpop.f32.mrf.mxu2 }
 0x2b3   : > { %v708_v33 = vpack.c.bf16 %v1605_v30, %v1603_v29 }
 0x2ba   : > { %v1607_v17 = vpop.f32.mrf.mxu2 }
 0x2c2   : > { %v1609_v31 = vpop.f32.mrf.mxu2 }
 0x2c3   : > { %v709_v32 = vpack.c.bf16 %v1609_v31, %v1607_v17 }
 0x2c5   : > { %710 = vmatpush.bf16.msra.mxu3 %v709_v32 }
 0x2c9   : > { %711 = vmatpush.bf16.msra.mxu3 %v708_v33 }
 0x2cd   : > { %712 = vmatpush.bf16.msra.mxu3 %v707_v34 }
 0x2d1   : > { %713 = vmatpush.bf16.msra.mxu3 %v706_v35 }
 0x2d5   : > { %714 = vmatpush.bf16.msra.mxu3 %v705_v18 }
 0x2d9   : > { %715 = vmatpush.bf16.msra.mxu3 %v704_v43 }
 0x2dd   : > { %716 = vmatpush.bf16.msra.mxu3 %v703_v44 }
 0x2e1   : > { %717 = vmatpush.bf16.msra.mxu3 %v702_v19 }
 0x2e4   : > { %718 = vmatmul.bf16.vlgmr.msra.gmra.mxu3 %v1445_v36 }
 0x2f4   : > { %723 = vmatmul.bf16.gmra.mxu3 %v1451_v37 }
 0x304   : > { %728 = vmatmul.bf16.gmra.mxu3 %v1457_v38  ;;  %v793_v38 = vld [vmem:[%s1810_s2] sm:$0xff] }
 0x314   : > { %733 = vmatmul.bf16.gmra.mxu3 %v1463_v39 }
 0x324   : > { %738 = vmatmul.bf16.gmra.mxu3 %v1469_v40 }
 0x334   : > { %743 = vmatmul.bf16.gmra.mxu3 %v1475_v41 }
 0x344   : > { %748 = vmatmul.bf16.gmra.mxu3 %v1481_v42 }
 0x354   : > { %753 = vmatmul.bf16.gmra.mxu3 %v1499_v47 }
 0x367   : > { %v719_v36 = vpop.f32.mrf.mxu3 }
 0x368   : > { %v760_v37 = vsel %vm759_vm2, %v719_v36, %v662_v9 }
 0x369   : > { %v777_v39 = vadd.f32 %v1634_v45, %v760_v37 }
 0x36b   : > { %v809_v40 = vsub.f32 %v777_v39, %v793_v38 }
 0x36d   : > { %v825_v41 = vmul.f32 %v809_v40, %v809_v40 }
 0x36f   : > { %v721_v42 = vpop.f32.mrf.mxu3  ;;  %v842_v47 = vsel %vm841_vm3, %v825_v41, 0.0 }
 0x370   : > { %v761_v51 = vsel %vm759_vm2, %v721_v42, %v664_v10  ;;  %843 = vadd.xlane.f32.xlu0 %v842_v47 }
 0x371   : > { %v778_v48 = vadd.f32 %v1634_v45, %v761_v51 }
 0x373   : > { %v810_v50 = vsub.f32 %v778_v48, %v794_v46 }
 0x375   : > { %v826_v53 = vmul.f32 %v810_v50, %v810_v50 }
 0x377   : > { %v724_v20 = vpop.f32.mrf.mxu3  ;;  %v845_v54 = vsel %vm841_vm3, %v826_v53, 0.0 }
 0x378   : > { %v762_v55 = vsel %vm759_vm2, %v724_v20, %v667_v11  ;;  %846 = vadd.xlane.f32.xlu0 %v845_v54 }
 0x379   : > { %v779_v56 = vadd.f32 %v1634_v45, %v762_v55 }
 0x37b   : > { %v811_v57 = vsub.f32 %v779_v56, %v795_v21 }
 0x37d   : > { %v827_v58 = vmul.f32 %v811_v57, %v811_v57 }
 0x37f   : > { %v726_v59 = vpop.f32.mrf.mxu3  ;;  %v857_v60 = vsel %vm841_vm3, %v827_v58, 0.0 }
 0x380   : > { %v763_v22 = vsel %vm759_vm2, %v726_v59, %v1585_v12  ;;  %858 = vadd.xlane.f32.xlu1 %v857_v60 }
 0x381   : > { %v780_v62 = vadd.f32 %v1634_v45, %v763_v22 }
 0x383   : > { %v812_v23 = vsub.f32 %v780_v62, %v796_v61 }
 0x385   : > { %v828_v63 = vmul.f32 %v812_v23, %v812_v23 }
 0x387   : > { %v729_v0 = vpop.f32.mrf.mxu3  ;;  %v860_v1 = vsel %vm841_vm3, %v828_v63, 0.0 }
 0x388   : > { %v764_v2 = vsel %vm759_vm2, %v729_v0, %v1587_v26  ;;  %861 = vadd.xlane.f32.xlu1 %v860_v1 }
 0x389   : > { %v781_v24 = vadd.f32 %v1634_v45, %v764_v2 }
 0x38b   : > { %v813_v4 = vsub.f32 %v781_v24, %v797_v3 }
 0x38d   : > { %v829_v5 = vmul.f32 %v813_v4, %v813_v4 }
 0x38f   : > { %v731_v25 = vpop.f32.mrf.mxu3  ;;  %v872_v6 = vsel %vm841_vm3, %v829_v5, 0.0 }
 0x390   : > { %v765_v7 = vsel %vm759_vm2, %v731_v25, %v1589_v13  ;;  %873 = vadd.xlane.f32.xlu2 %v872_v6  ;;  %v799_v13 = vld [vmem:[%s1810_s2 + $0x30] sm:$0xff] }
 0x391   : > { %v782_v9 = vadd.f32 %v1634_v45, %v765_v7 }
 0x393   : > { %v814_v10 = vsub.f32 %v782_v9, %v798_v8 }
 0x395   : > { %v830_v11 = vmul.f32 %v814_v10, %v814_v10 }
 0x397   : > { %v734_v12 = vpop.f32.mrf.mxu3  ;;  %v875_v26 = vsel %vm841_vm3, %v830_v11, 0.0 }
 0x398   : > { %v766_v32 = vsel %vm759_vm2, %v734_v12, %v1591_v14  ;;  %876 = vadd.xlane.f32.xlu2 %v875_v26  ;;  %v800_v14 = vld [vmem:[%s1810_s2 + $0x38] sm:$0xff] }
 0x399   : > { %v783_v33 = vadd.f32 %v1634_v45, %v766_v32 }
 0x39b   : > { %v815_v34 = vsub.f32 %v783_v33, %v799_v13 }
 0x39d   : > { %v831_v35 = vmul.f32 %v815_v34, %v815_v34 }
 0x39f   : > { %v736_v18 = vpop.f32.mrf.mxu3  ;;  %v887_v43 = vsel %vm841_vm3, %v831_v35, 0.0 }
 0x3a0   : > { %v767_v44 = vsel %vm759_vm2, %v736_v18, %v1593_v15  ;;  %888 = vadd.xlane.f32.xlu0 %v887_v43  ;;  %v801_v15 = vld [vmem:[%s1810_s2 + $0x40] sm:$0xff] }
 0x3a1   : > { %v784_v19 = vadd.f32 %v1634_v45, %v767_v44 }
 0x3a3   : > { %v816_v36 = vsub.f32 %v784_v19, %v800_v14 }
 0x3a5   : > { %v832_v37 = vmul.f32 %v816_v36, %v816_v36 }
 0x3a7   : > { %v739_v38 = vpop.f32.mrf.mxu3  ;;  %v890_v39 = vsel %vm841_vm3, %v832_v37, 0.0 }
 0x3a8   : > { %v768_v40 = vsel %vm759_vm2, %v739_v38, %v1595_v27  ;;  %891 = vadd.xlane.f32.xlu1 %v890_v39  ;;  %v802_v27 = vld [vmem:[%s1810_s2 + $0x48] sm:$0xff] }
 0x3a9   : > { %v785_v41 = vadd.f32 %v1634_v45, %v768_v40 }
 0x3ab   : > { %v817_v42 = vsub.f32 %v785_v41, %v801_v15 }
 0x3ad   : > { %v833_v47 = vmul.f32 %v817_v42, %v817_v42 }
 0x3af   : > { %v741_v51 = vpop.f32.mrf.mxu3  ;;  %v902_v46 = vsel %vm841_vm3, %v833_v47, 0.0 }
 0x3b0   : > { %v769_v48 = vsel %vm759_vm2, %v741_v51, %v1597_v52  ;;  %903 = vadd.xlane.f32.xlu2 %v902_v46  ;;  %v803_v52 = vld [vmem:[%s1810_s2 + $0x50] sm:$0xff] }
 0x3b1   : > { %v786_v50 = vadd.f32 %v1634_v45, %v769_v48 }
 0x3b3   : > { %v818_v53 = vsub.f32 %v786_v50, %v802_v27 }
 0x3b5   : > { %v834_v20 = vmul.f32 %v818_v53, %v818_v53 }
 0x3b7   : > { %v744_v54 = vpop.f32.mrf.mxu3  ;;  %v905_v55 = vsel %vm841_vm3, %v834_v20, 0.0 }
 0x3b8   : > { %v770_v21 = vsel %vm759_vm2, %v744_v54, %v1599_v28  ;;  %906 = vadd.xlane.f32.xlu0 %v905_v55  ;;  %v804_v28 = vld [vmem:[%s1810_s2 + $0x58] sm:$0xff] }
 0x3b9   : > { %v787_v56 = vadd.f32 %v1634_v45, %v770_v21 }
 0x3bb   : > { %v819_v57 = vsub.f32 %v787_v56, %v803_v52 }
 0x3bd   : > { %v835_v58 = vmul.f32 %v819_v57, %v819_v57 }
 0x3bf   : > { %v746_v59 = vpop.f32.mrf.mxu3  ;;  %v917_v60 = vsel %vm841_vm3, %v835_v58, 0.0 }
 0x3c0   : > { %v771_v22 = vsel %vm759_vm2, %v746_v59, %v1601_v16  ;;  %918 = vadd.xlane.f32.xlu1 %v917_v60  ;;  %v805_v16 = vld [vmem:[%s1810_s2 + $0x60] sm:$0xff] }
 0x3c1   : > { %v788_v61 = vadd.f32 %v1634_v45, %v771_v22 }
 0x3c3   : > { %v820_v62 = vsub.f32 %v788_v61, %v804_v28 }
 0x3c5   : > { %v836_v23 = vmul.f32 %v820_v62, %v820_v62 }
 0x3c7   : > { %v749_v63 = vpop.f32.mrf.mxu3  ;;  %v920_v0 = vsel %vm841_vm3, %v836_v23, 0.0 }
 0x3c8   : > { %v772_v1 = vsel %vm759_vm2, %v749_v63, %v1603_v29  ;;  %921 = vadd.xlane.f32.xlu2 %v920_v0  ;;  %v806_v29 = vld [vmem:[%s1810_s2 + $0x68] sm:$0xff] }
 0x3c9   : > { %v789_v2 = vadd.f32 %v1634_v45, %v772_v1 }
 0x3cb   : > { %v821_v3 = vsub.f32 %v789_v2, %v805_v16 }
 0x3cd   : > { %v837_v24 = vmul.f32 %v821_v3, %v821_v3 }
 0x3cf   : > { %v751_v4 = vpop.f32.mrf.mxu3  ;;  %v932_v5 = vsel %vm841_vm3, %v837_v24, 0.0 }
 0x3d0   : > { %v773_v25 = vsel %vm759_vm2, %v751_v4, %v1605_v30  ;;  %933 = vadd.xlane.f32.xlu0 %v932_v5  ;;  %v807_v30 = vld [vmem:[%s1810_s2 + $0x70] sm:$0xff] }
 0x3d1   : > { %v790_v6 = vadd.f32 %v1634_v45, %v773_v25 }
 0x3d3   : > { %v822_v7 = vsub.f32 %v790_v6, %v806_v29 }
 0x3d5   : > { %v838_v8 = vmul.f32 %v822_v7, %v822_v7 }
 0x3d7   : > { %v754_v9 = vpop.f32.mrf.mxu3  ;;  %v935_v10 = vsel %vm841_vm3, %v838_v8, 0.0 }
 0x3d8   : > { %v774_v11 = vsel %vm759_vm2, %v754_v9, %v1607_v17  ;;  %936 = vadd.xlane.f32.xlu1 %v935_v10  ;;  %v808_v17 = vld [vmem:[%s1810_s2 + $0x78] sm:$0xff] }
 0x3d9   : > { %v791_v12 = vadd.f32 %v1634_v45, %v774_v11 }
 0x3db   : > { %v823_v26 = vsub.f32 %v791_v12, %v807_v30 }
 0x3dd   : > { %v839_v32 = vmul.f32 %v823_v26, %v823_v26 }
 0x3df   : > { %v756_v13 = vpop.f32.mrf.mxu3  ;;  %v947_v33 = vsel %vm841_vm3, %v839_v32, 0.0 }
 0x3e0   : > { %v775_v34 = vsel %vm759_vm2, %v756_v13, %v1609_v31  ;;  %948 = vadd.xlane.f32.xlu2 %v947_v33 }
 0x3e1   : > { %v792_v35 = vadd.f32 %v1634_v45, %v775_v34 }
 0x3e3   : > { %v844_v18 = vpop.xlane.xlu0 %843  ;;  %v824_v43 = vsub.f32 %v792_v35, %v808_v17 }
 0x3e5   : > { %v840_v44 = vmul.f32 %v824_v43, %v824_v43 }
 0x3e7   : > { %v950_v14 = vsel %vm841_vm3, %v840_v44, 0.0 }
 0x3e8   : > { %951 = vadd.xlane.f32.xlu0 %v950_v14 }
 0x3eb   : > { %v847_v19 = vpop.xlane.xlu0 %846 }
 0x3ec   : > { %v848_v36 = vadd.f32 %v847_v19, %v844_v18 }
 0x3ee   : > { %v849_v37 = vrot.slane %v848_v36, 4 }
 0x3f0   : > { %v850_v38 = vadd.f32 %v849_v37, %v848_v36 }
 0x3f2   : > { %v851_v49 = vrot.slane %v850_v38, 2 }
 0x3f3   : > { %v859_v31 = vpop.xlane.xlu1 %858 }
 0x3f4   : > { %v852_v39 = vadd.f32 %v851_v49, %v850_v38 }
 0x3f6   : > { %v853_v40 = vrot.slane %v852_v39, 1 }
 0x3f8   : > { %v854_v15 = vadd.f32 %v853_v40, %v852_v39 }
 0x3fa   : > { %v855_v41 = vmul.f32 0.00390625, %v854_v15 }
 0x3fb   : > { %v862_v45 = vpop.xlane.xlu1 %861 }
 0x3fc   : > { %856 = vst [vmem:[%s1764_s28] sm:$0x1] %v855_v41  ;;  %v863_v42 = vadd.f32 %v862_v45, %v859_v31 }
 0x3fe   : > { %v864_v47 = vrot.slane %v863_v42, 4 }
 0x400   : > { %v865_v51 = vadd.f32 %v864_v47, %v863_v42 }
 0x402   : > { %v866_v46 = vrot.slane %v865_v51, 2 }
 0x403   : > { %v874_v48 = vpop.xlane.xlu2 %873 }
 0x404   : > { %v867_v27 = vadd.f32 %v866_v46, %v865_v51 }
 0x406   : > { %v868_v50 = vrot.slane %v867_v27, 1 }
 0x408   : > { %v869_v53 = vadd.f32 %v868_v50, %v867_v27 }
 0x40a   : > { %v870_v20 = vmul.f32 0.00390625, %v869_v53 }
 0x40b   : > { %v877_v54 = vpop.xlane.xlu2 %876 }
 0x40c   : > { %871 = vst [vmem:[%s1764_s28 + $0x1] sm:$0x1] %v870_v20  ;;  %v878_v55 = vadd.f32 %v877_v54, %v874_v48 }
 0x40e   : > { %v879_v21 = vrot.slane %v878_v55, 4 }
 0x410   : > { %v880_v52 = vadd.f32 %v879_v21, %v878_v55 }
 0x412   : > { %v881_v56 = vrot.slane %v880_v52, 2 }
 0x413   : > { %v889_v22 = vpop.xlane.xlu0 %888 }
 0x414   : > { %v882_v57 = vadd.f32 %v881_v56, %v880_v52 }
 0x416   : > { %v883_v58 = vrot.slane %v882_v57, 1 }
 0x418   : > { %v884_v59 = vadd.f32 %v883_v58, %v882_v57 }
 0x41a   : > { %v885_v60 = vmul.f32 0.00390625, %v884_v59 }
 0x41b   : > { %v892_v28 = vpop.xlane.xlu1 %891 }
 0x41c   : > { %886 = vst [vmem:[%s1764_s28 + $0x2] sm:$0x1] %v885_v60  ;;  %v893_v61 = vadd.f32 %v892_v28, %v889_v22 }
 0x41e   : > { %v894_v62 = vrot.slane %v893_v61, 4 }
 0x420   : > { %v895_v23 = vadd.f32 %v894_v62, %v893_v61 }
 0x422   : > { %v896_v63 = vrot.slane %v895_v23, 2 }
 0x423   : > { %v904_v3 = vpop.xlane.xlu2 %903 }
 0x424   : > { %v897_v0 = vadd.f32 %v896_v63, %v895_v23 }
 0x426   : > { %v898_v1 = vrot.slane %v897_v0, 1 }
 0x428   : > { %v899_v16 = vadd.f32 %v898_v1, %v897_v0 }
 0x42a   : > { %v900_v2 = vmul.f32 0.00390625, %v899_v16 }
 0x42b   : > { %v907_v24 = vpop.xlane.xlu0 %906 }
 0x42c   : > { %901 = vst [vmem:[%s1764_s28 + $0x3] sm:$0x1] %v900_v2  ;;  %v908_v4 = vadd.f32 %v907_v24, %v904_v3 }
 0x42e   : > { %v909_v5 = vrot.slane %v908_v4, 4 }
 0x430   : > { %v910_v25 = vadd.f32 %v909_v5, %v908_v4 }
 0x432   : > { %v911_v29 = vrot.slane %v910_v25, 2 }
 0x433   : > { %v919_v10 = vpop.xlane.xlu1 %918 }
 0x434   : > { %v912_v6 = vadd.f32 %v911_v29, %v910_v25 }
 0x436   : > { %v913_v7 = vrot.slane %v912_v6, 1 }
 0x438   : > { %v914_v8 = vadd.f32 %v913_v7, %v912_v6 }
 0x43a   : > { %v915_v9 = vmul.f32 0.00390625, %v914_v8 }
 0x43b   : > { %v922_v11 = vpop.xlane.xlu2 %921 }
 0x43c   : > { %916 = vst [vmem:[%s1764_s28 + $0x4] sm:$0x1] %v915_v9  ;;  %v923_v30 = vadd.f32 %v922_v11, %v919_v10 }
 0x43e   : > { %v924_v12 = vrot.slane %v923_v30, 4 }
 0x440   : > { %v925_v26 = vadd.f32 %v924_v12, %v923_v30 }
 0x442   : > { %v926_v32 = vrot.slane %v925_v26, 2 }
 0x443   : > { %v934_v35 = vpop.xlane.xlu0 %933 }
 0x444   : > { %v927_v13 = vadd.f32 %v926_v32, %v925_v26 }
 0x446   : > { %v928_v33 = vrot.slane %v927_v13, 1 }
 0x448   : > { %v929_v34 = vadd.f32 %v928_v33, %v927_v13 }
 0x44a   : > { %v930_v17 = vmul.f32 0.00390625, %v929_v34 }
 0x44b   : > { %v937_v18 = vpop.xlane.xlu1 %936 }
 0x44c   : > { %931 = vst [vmem:[%s1764_s28 + $0x5] sm:$0x1] %v930_v17  ;;  %v938_v43 = vadd.f32 %v937_v18, %v934_v35 }
 0x44e   : > { %v939_v44 = vrot.slane %v938_v43, 4 }
 0x450   : > { %v940_v14 = vadd.f32 %v939_v44, %v938_v43 }
 0x452   : > { %v941_v19 = vrot.slane %v940_v14, 2 }
 0x453   : > { %v949_v31 = vpop.xlane.xlu2 %948 }
 0x454   : > { %v942_v36 = vadd.f32 %v941_v19, %v940_v14 }
 0x456   : > { %v943_v37 = vrot.slane %v942_v36, 1 }
 0x458   : > { %v944_v38 = vadd.f32 %v943_v37, %v942_v36 }
 0x45a   : > { %v945_v49 = vmul.f32 0.00390625, %v944_v38 }
 0x45b   : > { %v952_v39 = vpop.xlane.xlu0 %951 }
 0x45c   : > { %946 = vst [vmem:[%s1764_s28 + $0x6] sm:$0x1] %v945_v49  ;;  %v953_v40 = vadd.f32 %v952_v39, %v949_v31 }
 0x45e   : > { %v954_v15 = vrot.slane %v953_v40, 4 }
 0x460   : > { %v955_v41 = vadd.f32 %v954_v15, %v953_v40 }
 0x462   : > { %v956_v45 = vrot.slane %v955_v41, 2 }
 0x464   : > { %v957_v42 = vadd.f32 %v956_v45, %v955_v41 }
 0x466   : > { %v958_v47 = vrot.slane %v957_v42, 1 }
 0x468   : > { %v959_v51 = vadd.f32 %v958_v47, %v957_v42 }
 0x46a   : > { %v960_v46 = vmul.f32 0.00390625, %v959_v51 }
 0x46c   : > { %961 = vst [vmem:[%s1764_s28 + $0x7] sm:$0x1] %v960_v46 }
 0x46d   : > { %1250 = shalt.err (!%p1247_p3)
}
 0x46e   : > { %1184 = dma.vmem_to_hbm [thread:$0]  (%p1360_p5), %s976_s12, 128, %s978_s13, %s963_s14  }
 0x46f PF: > { %p1190_p4 = scmp.ge.s32.totalorder %s1285_s24, 2  ;;  %s989_s20 = sand.u32 1, %s1273_s21  }
 0x470   : > { %s990_s28 = scalar_lea.sflag [#allocation3], %s989_s20 }
 0x471   : > { %p1187_p7 = pnand %p1190_p4, %p1364_p6 }
 0x473   : > { %p1188_p8 = pneg %p1187_p7 }
 0x475   : > { %1268 = dma.done.wait (%p1188_p8), %s990_s28, 128  }
 0x476   : > { %1270 = vsyncadd (%p1188_p8), %s990_s28, 4294967168  ;;  %p16_p9 = scmp.ge.s32.totalorder %s1347_s27, 4   ;;  %s1817_s21 = smov %s1277_s22 }
 0x477   : > { %s1818_s22 = smov %s1281_s23  ;;  %s1819_s23 = smov %s1358_s30 }
 0x478   : > { %s1820_s24 = smov %s1347_s27  ;;  %18 = sbr.rel (!%p16_p9) target bundleno = 3 (0x3), region = 79 }
 0x47d   :  { %996 = vsyncpa [#allocation3], 1 }
 0x47e   :  { %998 = vsyncpa [#allocation3 + $0x1], 1 }

</bundles_post_ra>
